<compile_context>
chip_gen: v5e
topology: v5e:2x2
jax: 0.10.0
libtpu: 0.0.40
codegen_flags: <defaults>
</compile_context>

<pallas_src>
import jax
import jax.numpy as jnp
from jax.experimental import pallas as pl
from jax.experimental.pallas import tpu as pltpu


# ~8 MiB of x data per grid step: good per-step/overhead ratio on v5e/v6e/v7x,
# and double-buffered it stays comfortably inside every generation's VMEM.
_X_TILE_TARGET_BYTES = 8 << 20


def _round_up(a, b):
    return (a + b - 1) // b * b


def _largest_divisor_le(n, k):
    """Largest divisor of n that is <= k (>= 1). Keeps batch blocking exact."""
    k = max(1, min(n, k))
    for d in range(k, 0, -1):
        if n % d == 0:
            return d
    return 1


def _output_conv_kernel(x_ref, w_ref, b_ref, o_ref):
    # x_ref: (n_blk, C, *spatial_tile) VMEM
    # w_ref: (C,) SMEM    b_ref: (1,) SMEM
    # o_ref: (n_blk, 1, *spatial_tile) VMEM
    #
    # Unrolled per-channel scalar x vector multiply-add: the SMEM scalar splat
    # is free and the reduction over C is plain VPU adds on dense vregs.
    C = x_ref.shape[1]
    acc = w_ref[0] * x_ref[:, 0:1]
    for c in range(1, C):
        acc = acc + w_ref[c] * x_ref[:, c:c + 1]
    o_ref[...] = jax.nn.sigmoid(acc + b_ref[0]).astype(o_ref.dtype)


def output_conv(x_nchw, weight, bias):
    """1x1 conv (C -> 1) + sigmoid, matching nn.Conv2d(in_ch, 1, kernel_size=1).

    x_nchw: (N, C, H, W) float32
    weight: (1, C, 1, 1) float32  (PyTorch conv weight layout)
    bias:   (1,)         float32
    returns (N, 1, H, W) float32
    """
    N, C, H, W = x_nchw.shape
    HW = H * W

    w = weight.reshape(C)   # per-channel scalars -> SMEM
    b = bias.reshape(1)     # bias scalar        -> SMEM

    if HW % 128 == 0 and HW >= 128:
        # --- Fast path: spatial axis on (sublanes, lanes) -------------------
        # Free reshape (last-dim split); dense vregs independent of C.
        R = HW // 128
        x = x_nchw.reshape(N, C, R, 128)

        bytes_per_row = C * 128 * 4                       # one 128-lane row, all C
        rows_target = max(1, _X_TILE_TARGET_BYTES // bytes_per_row)
        if rows_target >= R:
            # Whole spatial extent fits one step: fold batch items instead so
            # each step still moves a big block (small-HW case).
            rows_tile = R
            n_blk = _largest_divisor_le(
                N, max(1, _X_TILE_TARGET_BYTES // (R * bytes_per_row)))
        else:
            n_blk = 1
            # Multiple of 8 sublanes (or the full extent) keeps blocks legal.
            rows_tile = min(max(8, (rows_target // 8) * 8), R)

        grid = (N // n_blk, pl.cdiv(R, rows_tile))
        x_spec = pl.BlockSpec((n_blk, C, rows_tile, 128),
                              lambda nb, rb: (nb, 0, rb, 0))
        out_spec = pl.BlockSpec((n_blk, 1, rows_tile, 128),
                                lambda nb, rb: (nb, 0, rb, 0))
        out_shape = jax.ShapeDtypeStruct((N, 1, R, 128), x.dtype)

        sub_rows = _round_up(rows_tile, 8)                # real sublane footprint
        x_tile_bytes = n_blk * C * sub_rows * 128 * 4
        o_tile_bytes = n_blk * 1 * sub_rows * 128 * 4
    else:
        # --- Ragged-HW fallback: channels on sublanes, HW on lanes ----------
        # Still no pad/slice HBM pass: either the whole HW extent is one block
        # (always legal) or a 128-multiple lane tile with a partial last block
        # (Pallas drops out-of-bounds writes; the reduction never mixes lanes,
        # so padding garbage cannot leak into valid outputs).
        x = x_nchw.reshape(N, C, HW)

        lanes_target = max(128, ((_X_TILE_TARGET_BYTES // (C * 4)) // 128) * 128)
        if HW <= lanes_target:
            t_hw = HW
            n_blk = _largest_divisor_le(
                N, max(1, _X_TILE_TARGET_BYTES // (C * HW * 4)))
        else:
            t_hw = lanes_target
            n_blk = 1

        grid = (N // n_blk, pl.cdiv(HW, t_hw))
        x_spec = pl.BlockSpec((n_blk, C, t_hw), lambda nb, tb: (nb, 0, tb))
        out_spec = pl.BlockSpec((n_blk, 1, t_hw), lambda nb, tb: (nb, 0, tb))
        out_shape = jax.ShapeDtypeStruct((N, 1, HW), x.dtype)

        x_tile_bytes = n_blk * _round_up(C, 8) * _round_up(t_hw, 128) * 4
        o_tile_bytes = n_blk * 8 * _round_up(t_hw, 128) * 4

    # Derived scoped-VMEM budget: double-buffered input + output tiles plus
    # headroom; floored at 32 MiB (covers v5e's 16 MiB default), capped at 48.
    vmem_limit = min(max(2 * (x_tile_bytes + o_tile_bytes) + (4 << 20),
                         32 << 20), 48 << 20)

    cost = pl.CostEstimate(
        flops=2 * N * C * HW,
        transcendentals=N * HW,                              # sigmoid exp
        bytes_accessed=(N * C * HW + N * HW + C + 1) * 4,
    )

    out = pl.pallas_call(
        _output_conv_kernel,
        out_shape=out_shape,
        grid_spec=pltpu.PrefetchScalarGridSpec(
            num_scalar_prefetch=0,
            grid=grid,
            in_specs=[
                x_spec,
                pl.BlockSpec(memory_space=pltpu.MemorySpace.SMEM),  # weights (C,)
                pl.BlockSpec(memory_space=pltpu.MemorySpace.SMEM),  # bias (1,)
            ],
            out_specs=out_spec,
        ),
        compiler_params=pltpu.CompilerParams(
            dimension_semantics=("parallel", "parallel"),
            vmem_limit_bytes=vmem_limit,
        ),
        cost_estimate=cost,
    )(x, w, b)

    return out.reshape(N, 1, H, W)


def reference(x_nchw, weight, bias):
    # Pure-JAX reference of Conv2d(kernel_size=1) + sigmoid.
    w = weight.reshape(1, -1)                         # (1, C)
    y = jnp.einsum("oc,nchw->nohw", w, x_nchw) + bias.reshape(1, 1, 1, 1)
    return jax.nn.sigmoid(y)


if __name__ == "__main__":
    key = jax.random.PRNGKey(0)
    kx, kw, kb = jax.random.split(key, 3)

    N, C, H, W = 2, 4, 16, 16
    x = jax.random.normal(kx, (N, C, H, W), dtype=jnp.float32)

    # Deterministic parameter init (same shapes as nn.Conv2d(in_ch, 1, 1)).
    bound = 1.0 / (C ** 0.5)
    weight = jax.random.uniform(kw, (1, C, 1, 1), dtype=jnp.float32,
                                minval=-bound, maxval=bound)
    bias = jax.random.uniform(kb, (1,), dtype=jnp.float32,
                              minval=-bound, maxval=bound)

    out = output_conv(x, weight, bias)
    out = jax.block_until_ready(out)

    ref = reference(x, weight, bias)
    assert out.shape == (N, 1, H, W), out.shape
    assert jnp.allclose(out, ref, atol=1e-5, rtol=1e-5), "mismatch vs reference"

    print("KERNEL_OK")
</pallas_src>

<mosaic_0001>
module attributes {stable_mosaic.version = 11 : i64} {
  func.func @_output_conv_kernel(%arg0: i32, %arg1: i32, %arg2: memref<2x4x2x128xf32, #tpu.memory_space<vmem>>, %arg3: memref<4xf32, #tpu.memory_space<smem>>, %arg4: memref<1xf32, #tpu.memory_space<smem>>, %arg5: memref<2x1x2x128xf32, #tpu.memory_space<vmem>>) attributes {dimension_semantics = [#tpu.dimension_semantics<parallel>, #tpu.dimension_semantics<parallel>], iteration_bounds = array<i64: 1, 1>, scalar_prefetch = 0 : i64, scratch_operands = 0 : i64, tpu.core_type = #tpu.core_type<tc>, window_params = [{transform_indices = @transform_0, window_bounds = array<i64: 2, 4, 2, 128>}, {transform_indices = @transform_1, window_bounds = array<i64: 4>}, {transform_indices = @transform_2, window_bounds = array<i64: 1>}, {transform_indices = @transform_3, window_bounds = array<i64: 2, 1, 2, 128>}]} {
    %c0 = arith.constant 0 : index
    %0 = memref.load %arg3[%c0] : memref<4xf32, #tpu.memory_space<smem>>
    %c0_0 = arith.constant 0 : index
    %c0_1 = arith.constant 0 : index
    %c0_2 = arith.constant 0 : index
    %c0_3 = arith.constant 0 : index
    %1 = vector.load %arg2[%c0_0, %c0_1, %c0_2, %c0_3] : memref<2x4x2x128xf32, #tpu.memory_space<vmem>>, vector<2x1x2x128xf32>
    %2 = vector.broadcast %0 : f32 to vector<2x1x2x128xf32>
    %3 = arith.mulf %2, %1 : vector<2x1x2x128xf32>
    %c1 = arith.constant 1 : index
    %4 = memref.load %arg3[%c1] : memref<4xf32, #tpu.memory_space<smem>>
    %c0_4 = arith.constant 0 : index
    %c1_5 = arith.constant 1 : index
    %c0_6 = arith.constant 0 : index
    %c0_7 = arith.constant 0 : index
    %5 = vector.load %arg2[%c0_4, %c1_5, %c0_6, %c0_7] : memref<2x4x2x128xf32, #tpu.memory_space<vmem>>, vector<2x1x2x128xf32>
    %6 = vector.broadcast %4 : f32 to vector<2x1x2x128xf32>
    %7 = arith.mulf %6, %5 : vector<2x1x2x128xf32>
    %8 = arith.addf %3, %7 : vector<2x1x2x128xf32>
    %c2 = arith.constant 2 : index
    %9 = memref.load %arg3[%c2] : memref<4xf32, #tpu.memory_space<smem>>
    %c0_8 = arith.constant 0 : index
    %c2_9 = arith.constant 2 : index
    %c0_10 = arith.constant 0 : index
    %c0_11 = arith.constant 0 : index
    %10 = vector.load %arg2[%c0_8, %c2_9, %c0_10, %c0_11] : memref<2x4x2x128xf32, #tpu.memory_space<vmem>>, vector<2x1x2x128xf32>
    %11 = vector.broadcast %9 : f32 to vector<2x1x2x128xf32>
    %12 = arith.mulf %11, %10 : vector<2x1x2x128xf32>
    %13 = arith.addf %8, %12 : vector<2x1x2x128xf32>
    %c3 = arith.constant 3 : index
    %14 = memref.load %arg3[%c3] : memref<4xf32, #tpu.memory_space<smem>>
    %c0_12 = arith.constant 0 : index
    %c3_13 = arith.constant 3 : index
    %c0_14 = arith.constant 0 : index
    %c0_15 = arith.constant 0 : index
    %15 = vector.load %arg2[%c0_12, %c3_13, %c0_14, %c0_15] : memref<2x4x2x128xf32, #tpu.memory_space<vmem>>, vector<2x1x2x128xf32>
    %16 = vector.broadcast %14 : f32 to vector<2x1x2x128xf32>
    %17 = arith.mulf %16, %15 : vector<2x1x2x128xf32>
    %18 = arith.addf %13, %17 : vector<2x1x2x128xf32>
    %c0_16 = arith.constant 0 : index
    %19 = memref.load %arg4[%c0_16] : memref<1xf32, #tpu.memory_space<smem>>
    %20 = vector.broadcast %19 : f32 to vector<2x1x2x128xf32>
    %21 = arith.addf %18, %20 : vector<2x1x2x128xf32>
    %22 = arith.negf %21 : vector<2x1x2x128xf32>
    %23 = math.exp %22 : vector<2x1x2x128xf32>
    %cst = arith.constant 1.000000e+00 : f32
    %24 = vector.broadcast %cst : f32 to vector<2x1x2x128xf32>
    %25 = arith.addf %24, %23 : vector<2x1x2x128xf32>
    %26 = arith.divf %24, %25 : vector<2x1x2x128xf32>
    %c0_17 = arith.constant 0 : index
    %c0_18 = arith.constant 0 : index
    %c0_19 = arith.constant 0 : index
    %c0_20 = arith.constant 0 : index
    %27 = vector.load %arg5[%c0_17, %c0_18, %c0_19, %c0_20] : memref<2x1x2x128xf32, #tpu.memory_space<vmem>>, vector<2x1x2x128xf32>
    tpu.vector_store %arg5[%c0_17, %c0_18, %c0_19, %c0_20], %26 {strides = array<i32>} : memref<2x1x2x128xf32, #tpu.memory_space<vmem>>, vector<2x1x2x128xf32>,
    return
  }
  func.func @transform_0(%arg0: i32, %arg1: i32) -> (i32, i32, i32, i32) {
    %c0_i32 = arith.constant 0 : i32
    %c0_i32_0 = arith.constant 0 : i32
    %c0_i32_1 = arith.constant 0 : i32
    return %arg0, %c0_i32, %arg1, %c0_i32_0 : i32, i32, i32, i32
  }
  func.func @transform_1(%arg0: i32, %arg1: i32) -> i32 {
    %c0_i32 = arith.constant 0 : i32
    %c0_i32_0 = arith.constant 0 : i32
    return %c0_i32 : i32
  }
  func.func @transform_2(%arg0: i32, %arg1: i32) -> i32 {
    %c0_i32 = arith.constant 0 : i32
    %c0_i32_0 = arith.constant 0 : i32
    return %c0_i32 : i32
  }
  func.func @transform_3(%arg0: i32, %arg1: i32) -> (i32, i32, i32, i32) {
    %c0_i32 = arith.constant 0 : i32
    %c0_i32_0 = arith.constant 0 : i32
    %c0_i32_1 = arith.constant 0 : i32
    return %arg0, %c0_i32, %arg1, %c0_i32_0 : i32, i32, i32, i32
  }
}

</mosaic_0001>

<bundles_post_ra>
// kernel: tpu_custom_call.1
= control target key start
LH: loop header
LB: loop body
LE: loop exit
PB: predicated region body
PF: predicated region fallthrough
CT: control target
= control target key end

     0   :  { %9 = vsyncpa [#allocation4], 0  ;;  %s269_s0 = inlined_call_operand.hbm [shape: f32[2,4,2,128], index: 0, kind: input, shape index: {}]   ;;  %s270_s1 = inlined_call_operand.vmem [shape: f32[4], index: 1, kind: input, shape index: {}]   ;;  %s271_s2 = inlined_call_operand.<no memory space> [shape: f32[1], index: 2, kind: input, shape index: {}]   ;;  %s272_s3 = inlined_call_operand.hbm [shape: f32[2,1,2,128], index: 3, kind: output, shape index: {}]  }
   0x1   :  { %10 = vsyncpa [#allocation6], 0 }
   0x2   :  { %11 = vsyncpa [#allocation5], 0  ;;  %s16_s14 = sshll.u32 %s269_s0, 4  ;;  %s226_s15 = smov [#allocation3]   ;;  %s17_s14 = int_to_ptr.hbm [resolvable:$true] %s16_s14 }
   0x3   :  { %s18_s16 = sshll.u32 %s226_s15, 4  ;;  %s30_s19 = sshll.u32 %s270_s1, 4  ;;  %s19_s16 = int_to_ptr.vmem [resolvable:$true] %s18_s16  ;;  %s31_s19 = int_to_ptr.vmem [resolvable:$true] %s30_s19 }
   0x4   :  { %s227_s20 = smov 32   ;;  %s228_s21 = smov 2  }
   0x5   :  { %24 = dma.hbm_to_vmem [thread:$0]  %s17_s14, 256, %s19_s16, [#allocation4], %s227_s20, %s227_s20, %s228_s21  }
   0x6   :  { %s229_s22 = smov [#allocation7]  }
   0x7   :  { %33 = dma.vmem_to_smem %s31_s19, 16, %s229_s22, [#allocation6]  }
   0x8   :  { %220 = dma.done.wait [#allocation4], 256  }
   0x9   :  { %221 = vsyncadd [#allocation4], 4294967040 }
   0xa   :  { %222 = dma.done.wait [#allocation6], 16  }
   0xb   :  { %223 = vsyncadd [#allocation6], 4294967280 }
   0xc   :  { %44 = sfence }
   0xd   :  { %s45_s0 = sld [smem:[#allocation7]]  ;;  %v46_v0 = vld [vmem:[#allocation3] sm:$0x3]  ;;  %v47_v1 = vld [vmem:[#allocation3 + $0x8] sm:$0x3]  ;;  %v79_v24 = vstv %s271_s2  ;;  %s230_s2 = smov [#allocation8]  }
   0xe   :  { %s142_s23 = sld [smem:[#allocation7 + $0x1]]  ;;  %v53_v2 = vld [vmem:[#allocation3 + $0x2] sm:$0x3]  ;;  %v54_v3 = vld [vmem:[#allocation3 + $0xa] sm:$0x3]  ;;  %s126_s27 = sshll.u32 %s230_s2, 4  ;;  %s127_s27 = int_to_ptr.vmem [resolvable:$true] %s126_s27 }
   0xf   :  { %s143_s24 = sld [smem:[#allocation7 + $0x2]]  ;;  %v62_v5 = vld [vmem:[#allocation3 + $0x4] sm:$0x3]  ;;  %v63_v6 = vld [vmem:[#allocation3 + $0xc] sm:$0x3]  ;;  %s128_s30 = sshll.u32 %s272_s3, 4  ;;  %s129_s30 = int_to_ptr.hbm [resolvable:$true] %s128_s30 }
  0x10   :  { %s144_s25 = sld [smem:[#allocation7 + $0x3]]  ;;  %v71_v9 = vld [vmem:[#allocation3 + $0x6] sm:$0x3]  ;;  %v72_v11 = vld [vmem:[#allocation3 + $0xe] sm:$0x3] }
  0x13   :  { %v48_v4 = vstv %s45_s0 }
  0x14   :  { %v49_v7 = vmul.f32 %v48_v4, %v46_v0  ;;  %v55_v8 = vstv %s142_s23  ;;  %v50_v10 = vmul.f32 %v48_v4, %v47_v1 }
  0x15   :  { %v56_v12 = vmul.f32 %v55_v8, %v53_v2  ;;  %v64_v13 = vstv %s143_s24  ;;  %v57_v14 = vmul.f32 %v55_v8, %v54_v3 }
  0x16   :  { %v65_v15 = vmul.f32 %v64_v13, %v62_v5  ;;  %v73_v16 = vstv %s144_s25  ;;  %v66_v17 = vmul.f32 %v64_v13, %v63_v6 }
  0x17   :  { %v58_v18 = vadd.f32 %v56_v12, %v49_v7  ;;  %v74_v19 = vmul.f32 %v73_v16, %v71_v9  ;;  %v59_v20 = vadd.f32 %v57_v14, %v50_v10  ;;  %v75_v21 = vmul.f32 %v73_v16, %v72_v11 }
  0x19   :  { %v67_v22 = vadd.f32 %v65_v15, %v58_v18  ;;  %v68_v23 = vadd.f32 %v66_v17, %v59_v20 }
  0x1b   :  { %v76_v25 = vadd.f32 %v74_v19, %v67_v22  ;;  %v77_v26 = vadd.f32 %v75_v21, %v68_v23 }
  0x1d   :  { %v80_v27 = vadd.f32 %v79_v24, %v76_v25  ;;  %v81_v28 = vadd.f32 %v79_v24, %v77_v26 }
  0x1f   :  { %v145_v29 = vmul.f32 -1.442695, %v80_v27  ;;  %v146_v30 = vmul.f32 -1.442695, %v81_v28 }
  0x21   :  { %152 = vpow2.f32 %v145_v29 }
  0x22   :  { %154 = vpow2.f32 %v146_v30 }
  0x27   :  { %v153_v31 = vpop.eup %152 }
  0x28   :  { %v155_v32 = vpop.eup %154  ;;  %v88_v33 = vadd.f32 1.0, %v153_v31 }
  0x29   :  { %v89_v34 = vadd.f32 1.0, %v155_v32 }
  0x2a   :  { %156 = vrcp.f32 %v88_v33  ;;  %vm95_vm0 = vweird.f32 %v88_v33  ;;  %v101_v38 = vand.u32 2147483648, %v88_v33  ;;  %v99_v41 = vand.u32 2147483647, %v88_v33 }
  0x2b   :  { %158 = vrcp.f32 %v89_v34  ;;  %v116_v42 = vand.u32 2147483648, %v89_v34  ;;  %vm110_vm2 = vweird.f32 %v89_v34  ;;  %v114_v44 = vand.u32 2147483647, %v89_v34 }
  0x2c   :  { %v102_v46 = vor.u32 1.1754944e-38, %v101_v38  ;;  %vm100_vm5 = vcmp.eq.f32.partialorder %v99_v41, 8.507059e+37 }
  0x2d   :  { %v117_v49 = vor.u32 1.1754944e-38, %v116_v42  ;;  %vm115_vm7 = vcmp.eq.f32.partialorder %v114_v44, 8.507059e+37 }
  0x30   :  { %v157_v35 = vpop.eup %156 }
  0x31   :  { %v159_v36 = vpop.eup %158  ;;  %v91_v37 = vmul.f32 %v157_v35, %v88_v33  ;;  %vm96_vm1 = vweird.f32 %v157_v35 }
  0x32   :  { %v106_v39 = vmul.f32 %v159_v36, %v89_v34  ;;  %vm111_vm3 = vweird.f32 %v159_v36  ;;  %vm97_vm4 = vmor %vm95_vm0, %vm96_vm1 }
  0x33   :  { %v92_v40 = vsub.f32 1.0, %v91_v37  ;;  %vm112_vm6 = vmor %vm110_vm2, %vm111_vm3 }
  0x34   :  { %v107_v43 = vsub.f32 1.0, %v106_v39 }
  0x35   :  { %v93_v45 = vmul.f32 %v157_v35, %v92_v40 }
  0x36   :  { %v108_v47 = vmul.f32 %v159_v36, %v107_v43 }
  0x37   :  { %v94_v48 = vadd.f32 %v157_v35, %v93_v45 }
  0x38   :  { %v109_v50 = vadd.f32 %v159_v36, %v108_v47 }
  0x39   :  { %v98_v51 = vsel %vm97_vm4, %v157_v35, %v94_v48 }
  0x3a   :  { %v103_v52 = vsel %vm100_vm5, %v102_v46, %v98_v51  ;;  %v113_v53 = vsel %vm112_vm6, %v159_v36, %v109_v50 }
  0x3b   :  { %120 = vst [vmem:[#allocation8] sm:$0x3] %v103_v52  ;;  %v118_v54 = vsel %vm115_vm7, %v117_v49, %v113_v53 }
  0x3c   :  { %121 = vst [vmem:[#allocation8 + $0x2] sm:$0x3] %v118_v54 }
  0x3d   :  { %134 = dma.vmem_to_hbm [thread:$0]  %s127_s27, 64, %s129_s30, [#allocation5], %s227_s20, %s227_s20, %s228_s21  }
  0x3e   :  { %224 = dma.done.wait [#allocation5], 64  }
  0x3f   :  { %225 = vsyncadd [#allocation5], 4294967232 }
  0x40   :  { %139 = vsyncpa [#allocation4], 1 }
  0x41   :  { %140 = vsyncpa [#allocation5], 1 }
  0x42   :  { %141 = vsyncpa [#allocation6], 1 }

</bundles_post_ra>
